<compile_context>
chip_gen: v7x
topology: tpu7x:2x2x1
jax: 0.10.0
libtpu: 0.0.40
codegen_flags: <defaults>
</compile_context>

<pallas_src>
import jax
import jax.numpy as jnp
from jax.experimental import pallas as pl
from jax.experimental.pallas import tpu as pltpu

STATE_DIM = 8
ACTION_DIM = 2
H1, H2 = 400, 300
MAX_BATCH_TILE = 256


def _round_up(n, m):
    return ((n + m - 1) // m) * m


def _critic_kernel(x_ref, a_ref, w1s_ref, w1a_ref, b1_ref, w2_ref, b2_ref,
                   w3_ref, b3_ref, o_ref):
    """One grid step = (critic head c, batch tile b): Linear-ReLU-Linear-ReLU-Linear."""
    c = pl.program_id(0)

    xb = x_ref[...].astype(jnp.bfloat16)              # (TB, S)
    ab = a_ref[...].astype(jnp.bfloat16)              # (TB, A)

    # Layer 1: replaces concat([x, a], 1) @ W1 with x@W1s + a@W1a (no concat).
    h1 = (jnp.dot(xb, w1s_ref[0], preferred_element_type=jnp.float32)
          + jnp.dot(ab, w1a_ref[0], preferred_element_type=jnp.float32)
          + b1_ref[0])
    h1 = jnp.maximum(h1, 0.0)                          # ReLU, (TB, H1) f32

    # Layer 2.
    h2 = jnp.dot(h1.astype(jnp.bfloat16), w2_ref[0],
                 preferred_element_type=jnp.float32) + b2_ref[0]
    h2 = jnp.maximum(h2, 0.0)                          # ReLU, (TB, H2) f32

    # Layer 3 (H2 -> 1): VPU multiply + lane reduction instead of an N=1 MXU pass.
    w3v = w3_ref[0].astype(jnp.float32)                # (1, H2)
    q = jnp.sum(h2 * w3v, axis=-1) + b3_ref[c]         # (TB,)

    # Lane-dense store: batch sits on the lane axis of the output block.
    o_ref[...] = q[None, None, :].astype(o_ref.dtype)  # (1, 1, TB)


def critic_net_forward(x, action, params):
    """Pallas forward of CriticNet. Returns (q1, q2), each (B, 1) float32."""
    w1s, w1a, b1, w2, b2, w3, b3 = params
    B = x.shape[0]

    tb = min(MAX_BATCH_TILE, _round_up(B, 8))          # batch tile, multiple of 8
    b_pad = _round_up(B, tb)
    if b_pad != B:
        x = jnp.pad(x, ((0, b_pad - B), (0, 0)))
        action = jnp.pad(action, ((0, b_pad - B), (0, 0)))
    nb = b_pad // tb

    out = pl.pallas_call(
        _critic_kernel,
        out_shape=jax.ShapeDtypeStruct((2, 1, b_pad), jnp.float32),
        grid_spec=pltpu.PrefetchScalarGridSpec(
            num_scalar_prefetch=0,
            # Critic head OUTER so the (c,0,0) weight index maps are constant
            # across the inner batch loop -> weights DMA'd once per head.
            grid=(2, nb),
            in_specs=[
                pl.BlockSpec((tb, STATE_DIM), lambda c, b: (b, 0)),         # x tile
                pl.BlockSpec((tb, ACTION_DIM), lambda c, b: (b, 0)),        # action tile
                pl.BlockSpec((1, STATE_DIM, H1), lambda c, b: (c, 0, 0)),   # W1_state
                pl.BlockSpec((1, ACTION_DIM, H1), lambda c, b: (c, 0, 0)),  # W1_action
                pl.BlockSpec((1, 1, H1), lambda c, b: (c, 0, 0)),           # b1
                pl.BlockSpec((1, H1, H2), lambda c, b: (c, 0, 0)),          # W2
                pl.BlockSpec((1, 1, H2), lambda c, b: (c, 0, 0)),           # b2
                pl.BlockSpec((1, 1, H2), lambda c, b: (c, 0, 0)),           # W3 row
                pl.BlockSpec(memory_space=pltpu.MemorySpace.SMEM),          # b3 scalars
            ],
            out_specs=pl.BlockSpec((1, 1, tb), lambda c, b: (c, 0, b)),
        ),
        compiler_params=pltpu.CompilerParams(
            # "parallel" head axis -> megacore sharding on v7x; no-op on v5e/v6e.
            dimension_semantics=("parallel", "arbitrary"),
        ),
    )(x, action, w1s, w1a, b1, w2, b2, w3, b3)

    q = out[:, 0, :B]                                  # (2, B)
    return q[0][:, None], q[1][:, None]


def init_params(key):
    """Synthetic parameters matching the PyTorch module, stacked over the two
    critic heads. W1 is split into state/action halves; weights are bf16,
    biases f32; W3 is stored in PyTorch's (out=1, in=H2) layout, i.e. a row."""
    ks = jax.random.split(key, 7)
    bf16, f32 = jnp.bfloat16, jnp.float32

    def unif(k, shape, fan_in, dtype):
        bound = 1.0 / jnp.sqrt(jnp.float32(fan_in))
        return jax.random.uniform(k, shape, jnp.float32, -bound, bound).astype(dtype)

    in_dim = STATE_DIM + ACTION_DIM
    w1s = unif(ks[0], (2, STATE_DIM, H1), in_dim, bf16)
    w1a = unif(ks[1], (2, ACTION_DIM, H1), in_dim, bf16)
    b1 = unif(ks[2], (2, 1, H1), in_dim, f32)
    w2 = unif(ks[3], (2, H1, H2), H1, bf16)
    b2 = unif(ks[4], (2, 1, H2), H1, f32)
    w3 = unif(ks[5], (2, 1, H2), H2, bf16)
    b3 = unif(ks[6], (2,), H2, f32)
    return (w1s, w1a, b1, w2, b2, w3, b3)


def _reference_forward(x, action, params):
    """Pure-JAX reference (same bf16-weight / f32-accumulation math)."""
    w1s, w1a, b1, w2, b2, w3, b3 = params
    f32, bf16 = jnp.float32, jnp.bfloat16
    outs = []
    for c in range(2):
        h1 = (jnp.dot(x.astype(bf16), w1s[c], preferred_element_type=f32)
              + jnp.dot(action.astype(bf16), w1a[c], preferred_element_type=f32)
              + b1[c])
        h1 = jnp.maximum(h1, 0.0)
        h2 = jnp.dot(h1.astype(bf16), w2[c], preferred_element_type=f32) + b2[c]
        h2 = jnp.maximum(h2, 0.0)
        q = jnp.sum(h2 * w3[c].astype(f32), axis=-1, keepdims=True) + b3[c]
        outs.append(q)
    return outs[0], outs[1]


if __name__ == "__main__":
    key = jax.random.PRNGKey(0)
    k_params, k_x, k_a = jax.random.split(key, 3)

    B = 8
    params = init_params(k_params)
    x = jax.random.normal(k_x, (B, STATE_DIM), jnp.float32)
    action = jax.random.normal(k_a, (B, ACTION_DIM), jnp.float32)

    q1, q2 = jax.jit(critic_net_forward)(x, action, params)
    jax.block_until_ready((q1, q2))

    r1, r2 = _reference_forward(x, action, params)
    assert q1.shape == (B, 1) and q2.shape == (B, 1)
    assert jnp.allclose(q1, r1, atol=2e-3, rtol=2e-3)
    assert jnp.allclose(q2, r2, atol=2e-3, rtol=2e-3)

    print("KERNEL_OK")
</pallas_src>

<mosaic_0001>
module attributes {stable_mosaic.version = 11 : i64} {
  func.func @_critic_kernel(%arg0: i32, %arg1: i32, %arg2: memref<8x8xf32, #tpu.memory_space<vmem>>, %arg3: memref<8x2xf32, #tpu.memory_space<vmem>>, %arg4: memref<1x8x400xbf16, #tpu.memory_space<vmem>>, %arg5: memref<1x2x400xbf16, #tpu.memory_space<vmem>>, %arg6: memref<1x1x400xf32, #tpu.memory_space<vmem>>, %arg7: memref<1x400x300xbf16, #tpu.memory_space<vmem>>, %arg8: memref<1x1x300xf32, #tpu.memory_space<vmem>>, %arg9: memref<1x1x300xbf16, #tpu.memory_space<vmem>>, %arg10: memref<2xf32, #tpu.memory_space<smem>>, %arg11: memref<1x1x8xf32, #tpu.memory_space<vmem>>) attributes {dimension_semantics = [#tpu.dimension_semantics<parallel>, #tpu.dimension_semantics<arbitrary>], iteration_bounds = array<i64: 2, 1>, scalar_prefetch = 0 : i64, scratch_operands = 0 : i64, tpu.core_type = #tpu.core_type<tc>, window_params = [{transform_indices = @transform_0, window_bounds = array<i64: 8, 8>}, {transform_indices = @transform_1, window_bounds = array<i64: 8, 2>}, {transform_indices = @transform_2, window_bounds = array<i64: 1, 8, 400>}, {transform_indices = @transform_3, window_bounds = array<i64: 1, 2, 400>}, {transform_indices = @transform_4, window_bounds = array<i64: 1, 1, 400>}, {transform_indices = @transform_5, window_bounds = array<i64: 1, 400, 300>}, {transform_indices = @transform_6, window_bounds = array<i64: 1, 1, 300>}, {transform_indices = @transform_7, window_bounds = array<i64: 1, 1, 300>}, {transform_indices = @transform_8, window_bounds = array<i64: 2>}, {transform_indices = @transform_9, window_bounds = array<i64: 1, 1, 8>}]} {
    %c0 = arith.constant 0 : index
    %c0_0 = arith.constant 0 : index
    %0 = vector.load %arg2[%c0, %c0_0] : memref<8x8xf32, #tpu.memory_space<vmem>>, vector<8x8xf32>
    %1 = arith.truncf %0 : vector<8x8xf32> to vector<8x8xbf16>
    %c0_1 = arith.constant 0 : index
    %c0_2 = arith.constant 0 : index
    %2 = vector.load %arg3[%c0_1, %c0_2] : memref<8x2xf32, #tpu.memory_space<vmem>>, vector<8x2xf32>
    %3 = arith.truncf %2 : vector<8x2xf32> to vector<8x2xbf16>
    %c0_3 = arith.constant 0 : index
    %c0_4 = arith.constant 0 : index
    %c0_5 = arith.constant 0 : index
    %4 = vector.load %arg4[%c0_3, %c0_4, %c0_5] : memref<1x8x400xbf16, #tpu.memory_space<vmem>>, vector<1x8x400xbf16>
    %5 = vector.shape_cast %4 : vector<1x8x400xbf16> to vector<8x400xbf16>
    %cst = arith.constant dense<0.000000e+00> : vector<8x400xf32>
    %6 = tpu.matmul %1, %5, %cst {dimension_numbers = #tpu.dot_dimension_numbers<[1], [0], [0], [1], [0, 0, 1, 1], [], []>} : vector<8x8xbf16>, vector<8x400xbf16>, vector<8x400xf32> -> vector<8x400xf32>
    %c0_6 = arith.constant 0 : index
    %c0_7 = arith.constant 0 : index
    %c0_8 = arith.constant 0 : index
    %7 = vector.load %arg5[%c0_6, %c0_7, %c0_8] : memref<1x2x400xbf16, #tpu.memory_space<vmem>>, vector<1x2x400xbf16>
    %8 = vector.shape_cast %7 : vector<1x2x400xbf16> to vector<2x400xbf16>
    %cst_9 = arith.constant dense<0.000000e+00> : vector<8x400xf32>
    %9 = tpu.matmul %3, %8, %cst_9 {dimension_numbers = #tpu.dot_dimension_numbers<[1], [0], [0], [1], [0, 0, 1, 1], [], []>} : vector<8x2xbf16>, vector<2x400xbf16>, vector<8x400xf32> -> vector<8x400xf32>
    %10 = arith.addf %6, %9 : vector<8x400xf32>
    %c0_10 = arith.constant 0 : index
    %c0_11 = arith.constant 0 : index
    %c0_12 = arith.constant 0 : index
    %11 = vector.load %arg6[%c0_10, %c0_11, %c0_12] : memref<1x1x400xf32, #tpu.memory_space<vmem>>, vector<1x1x400xf32>
    %12 = vector.shape_cast %11 : vector<1x1x400xf32> to vector<1x400xf32>
    %13 = vector.broadcast %12 : vector<1x400xf32> to vector<8x400xf32>
    %14 = arith.addf %10, %13 : vector<8x400xf32>
    %cst_13 = arith.constant 0.000000e+00 : f32
    %15 = vector.broadcast %cst_13 : f32 to vector<8x400xf32>
    %16 = arith.maximumf %14, %15 : vector<8x400xf32>
    %17 = arith.truncf %16 : vector<8x400xf32> to vector<8x400xbf16>
    %c0_14 = arith.constant 0 : index
    %c0_15 = arith.constant 0 : index
    %c0_16 = arith.constant 0 : index
    %18 = vector.load %arg7[%c0_14, %c0_15, %c0_16] : memref<1x400x300xbf16, #tpu.memory_space<vmem>>, vector<1x400x300xbf16>
    %19 = vector.shape_cast %18 : vector<1x400x300xbf16> to vector<400x300xbf16>
    %cst_17 = arith.constant dense<0.000000e+00> : vector<8x300xf32>
    %20 = tpu.matmul %17, %19, %cst_17 {dimension_numbers = #tpu.dot_dimension_numbers<[1], [0], [0], [1], [0, 0, 1, 1], [], []>} : vector<8x400xbf16>, vector<400x300xbf16>, vector<8x300xf32> -> vector<8x300xf32>
    %c0_18 = arith.constant 0 : index
    %c0_19 = arith.constant 0 : index
    %c0_20 = arith.constant 0 : index
    %21 = vector.load %arg8[%c0_18, %c0_19, %c0_20] : memref<1x1x300xf32, #tpu.memory_space<vmem>>, vector<1x1x300xf32>
    %22 = vector.shape_cast %21 : vector<1x1x300xf32> to vector<1x300xf32>
    %23 = vector.broadcast %22 : vector<1x300xf32> to vector<8x300xf32>
    %24 = arith.addf %20, %23 : vector<8x300xf32>
    %cst_21 = arith.constant 0.000000e+00 : f32
    %25 = vector.broadcast %cst_21 : f32 to vector<8x300xf32>
    %26 = arith.maximumf %24, %25 : vector<8x300xf32>
    %c0_22 = arith.constant 0 : index
    %c0_23 = arith.constant 0 : index
    %c0_24 = arith.constant 0 : index
    %27 = vector.load %arg9[%c0_22, %c0_23, %c0_24] : memref<1x1x300xbf16, #tpu.memory_space<vmem>>, vector<1x1x300xbf16>
    %28 = vector.shape_cast %27 : vector<1x1x300xbf16> to vector<1x300xbf16>
    %29 = arith.extf %28 : vector<1x300xbf16> to vector<1x300xf32>
    %30 = vector.broadcast %29 : vector<1x300xf32> to vector<8x300xf32>
    %31 = arith.mulf %26, %30 : vector<8x300xf32>
    %cst_25 = arith.constant dense<0.000000e+00> : vector<8xf32>
    %32 = vector.multi_reduction <add>, %31, %cst_25 [1] : vector<8x300xf32> to vector<8xf32>
    %33 = arith.index_cast %arg0 : i32 to index
    %34 = memref.load %arg10[%33] : memref<2xf32, #tpu.memory_space<smem>>
    %35 = vector.broadcast %34 : f32 to vector<8xf32>
    %36 = arith.addf %32, %35 : vector<8xf32>
    %37 = vector.shape_cast %36 : vector<8xf32> to vector<1x1x8xf32>
    %c0_26 = arith.constant 0 : index
    %c0_27 = arith.constant 0 : index
    %c0_28 = arith.constant 0 : index
    %38 = vector.load %arg11[%c0_26, %c0_27, %c0_28] : memref<1x1x8xf32, #tpu.memory_space<vmem>>, vector<1x1x8xf32>
    tpu.vector_store %arg11[%c0_26, %c0_27, %c0_28], %37 {strides = array<i32>} : memref<1x1x8xf32, #tpu.memory_space<vmem>>, vector<1x1x8xf32>,
    return
  }
  func.func @transform_0(%arg0: i32, %arg1: i32) -> (i32, i32) {
    %c0_i32 = arith.constant 0 : i32
    %c0_i32_0 = arith.constant 0 : i32
    return %arg1, %c0_i32 : i32, i32
  }
  func.func @transform_1(%arg0: i32, %arg1: i32) -> (i32, i32) {
    %c0_i32 = arith.constant 0 : i32
    %c0_i32_0 = arith.constant 0 : i32
    return %arg1, %c0_i32 : i32, i32
  }
  func.func @transform_2(%arg0: i32, %arg1: i32) -> (i32, i32, i32) {
    %c0_i32 = arith.constant 0 : i32
    %c0_i32_0 = arith.constant 0 : i32
    %c0_i32_1 = arith.constant 0 : i32
    return %arg0, %c0_i32, %c0_i32_0 : i32, i32, i32
  }
  func.func @transform_3(%arg0: i32, %arg1: i32) -> (i32, i32, i32) {
    %c0_i32 = arith.constant 0 : i32
    %c0_i32_0 = arith.constant 0 : i32
    %c0_i32_1 = arith.constant 0 : i32
    return %arg0, %c0_i32, %c0_i32_0 : i32, i32, i32
  }
  func.func @transform_4(%arg0: i32, %arg1: i32) -> (i32, i32, i32) {
    %c0_i32 = arith.constant 0 : i32
    %c0_i32_0 = arith.constant 0 : i32
    %c0_i32_1 = arith.constant 0 : i32
    return %arg0, %c0_i32, %c0_i32_0 : i32, i32, i32
  }
  func.func @transform_5(%arg0: i32, %arg1: i32) -> (i32, i32, i32) {
    %c0_i32 = arith.constant 0 : i32
    %c0_i32_0 = arith.constant 0 : i32
    %c0_i32_1 = arith.constant 0 : i32
    return %arg0, %c0_i32, %c0_i32_0 : i32, i32, i32
  }
  func.func @transform_6(%arg0: i32, %arg1: i32) -> (i32, i32, i32) {
    %c0_i32 = arith.constant 0 : i32
    %c0_i32_0 = arith.constant 0 : i32
    %c0_i32_1 = arith.constant 0 : i32
    return %arg0, %c0_i32, %c0_i32_0 : i32, i32, i32
  }
  func.func @transform_7(%arg0: i32, %arg1: i32) -> (i32, i32, i32) {
    %c0_i32 = arith.constant 0 : i32
    %c0_i32_0 = arith.constant 0 : i32
    %c0_i32_1 = arith.constant 0 : i32
    return %arg0, %c0_i32, %c0_i32_0 : i32, i32, i32
  }
  func.func @transform_8(%arg0: i32, %arg1: i32) -> i32 {
    %c0_i32 = arith.constant 0 : i32
    %c0_i32_0 = arith.constant 0 : i32
    return %c0_i32 : i32
  }
  func.func @transform_9(%arg0: i32, %arg1: i32) -> (i32, i32, i32) {
    %c0_i32 = arith.constant 0 : i32
    %c0_i32_0 = arith.constant 0 : i32
    return %arg0, %c0_i32, %arg1 : i32, i32, i32
  }
}

</mosaic_0001>

<bundles_post_ra>
// kernel: critic_net_forward.1
= control target key start
LH: loop header
LB: loop body
LE: loop exit
PB: predicated region body
PF: predicated region fallthrough
CT: control target
= control target key end

     0   :  { %s2594_s0 = inlined_call_operand.vmem [shape: f32[8,8], index: 0, kind: input, shape index: {}]   ;;  %s2595_s1 = inlined_call_operand.vmem [shape: f32[8,2], index: 1, kind: input, shape index: {}]   ;;  %s2596_s2 = inlined_call_operand.hbm [shape: bf16[2,8,400], index: 2, kind: input, shape index: {}]   ;;  %s2597_s3 = inlined_call_operand.vmem [shape: bf16[2,2,400], index: 3, kind: input, shape index: {}]   ;;  %s2598_s4 = inlined_call_operand.vmem [shape: f32[2,1,400], index: 4, kind: input, shape index: {}]   ;;  %s2599_s5 = inlined_call_operand.hbm [shape: bf16[2,400,300], index: 5, kind: input, shape index: {}]   ;;  %s2600_s6 = inlined_call_operand.vmem [shape: f32[2,1,300], index: 6, kind: input, shape index: {}]   ;;  %s2601_s7 = inlined_call_operand.vmem [shape: bf16[2,1,300], index: 7, kind: input, shape index: {}]   ;;  %s2602_s8 = inlined_call_operand.vmem [shape: f32[2], index: 8, kind: input, shape index: {}]   ;;  %s2603_s9 = inlined_call_operand.vmem [shape: f32[2,1,8], index: 9, kind: output, shape index: {}]  }
   0x1   :  { %2608 = sst [smem:[#allocation12_spill]] %s2596_s2 }
   0x2   :  { %2609 = sst [smem:[#allocation13_spill]] %s2602_s8 }
   0x3   :  { %14 = vsyncpa [#allocation3], 0 }
   0x4   :  { %16 = vsyncpa [#allocation3 + $0x1], 0 }
   0x5   :  { %17 = vsyncpa [#allocation6], 0 }
   0x6   :  { %19 = vsyncpa [#allocation6 + $0x1], 0 }
   0x7   :  { %20 = vsyncpa [#allocation4], 0  ;;  %s2238_s30 = smov 0   ;;  %s2240_s10 = smov 0  }
   0x8   :  { %s2242_s11 = smov 0   ;;  %s2244_s12 = smov 0  }
   0x9   :  { %s2246_s13 = smov 0   ;;  %s2248_s14 = smov 0  }
   0xa LB: > { %s1726_s15 = sadd.s32 4294967295, %s2179_s14   ;;  %p110_p0 = scmp.ne.s32.totalorder %s2163_s10, %s2159_s30  ;;  %s2179_s14 = sphi %s2248_s14, %s26_s14   ;;  %s2175_s13 = sphi %s2246_s13, %s2627_s13   ;;  %s2171_s12 = sphi %s2244_s12, %s2626_s12   ;;  %s2167_s11 = sphi %s2242_s11, %s2625_s11   ;;  %s2163_s10 = sphi %s2240_s10, %s2624_s10   ;;  %s2159_s30 = sphi %s2238_s30, %s2623_s30  }
   0xb   : > { %p2268_p1 = scmp.eq.s32.totalorder %s1726_s15, 0  ;;  %p1728_p2 = scmp.ge.s32.totalorder %s2179_s14, 1 }
   0xc   : > { %p300_p3 = scmp.lt.s32.totalorder %s2179_s14, 3  ;;  %s2612_s8 = sld [smem:[#allocation13_spill]] }
   0xd   : > { %s2610_s16 = scalar_select %p2268_p1, 1, 0 }
   0xe   : > { %p2276_p4 = por %p2268_p1, %p110_p0  ;;  %p2283_p5 = pnand %p1728_p2, %p300_p3 }
   0xf   : > { %s38_s23 = sadd.s32 1, %s2175_s13  ;;  %s97_s24 = sadd.s32 1, %s2167_s11 }
  0x10   : > { %s2611_s17 = scalar_select %p2276_p4, 1, 0 }
  0x11   : > { %p1875_p6 = pneg %p2283_p5  ;;  %p40_p8 = scmp.ge.s32.totalorder %s38_s23, 2 }
  0x12   : > { %s327_s20 = sshll.u32 %s2612_s8, 4  ;;  %s328_s20 = int_to_ptr.vmem [resolvable:$true] %s327_s20 }
  0x13   : > { %p2291_p7 = pnand %p1875_p6, %p2268_p1  ;;  %s2046_s25 = scalar_lea.vmem %s328_s20, 16 }
  0x14   : > { %p2047_p9 = scmp.ne.s32.totalorder %s328_s20, %s2046_s25  ;;  %p2054_p13 = scmp.lt.s32.totalorder %s328_s20, %s328_s20 }
  0x15   : > { %p2048_p10 = pneg %p2291_p7  ;;  %p2055_p0 = scmp.lt.s32.totalorder %s2046_s25, %s2046_s25 }
  0x17   : > { %p2049_p11 = pnand %p2048_p10, %p2047_p9  ;;  %p2056_p2 = por %p2055_p0, %p2054_p13 }
  0x19   : > { %p2050_p12 = pneg %p2049_p11 }
  0x1b   : > { %p2057_p3 = pnand %p2056_p2, %p2050_p12 }
  0x1d   : > { %2060 = shalt.err (!%p2057_p3)
}
  0x1e   : > { %s2181_s26 = smov [#allocation7]   ;;  %s2629_s23 = smov (%p40_p8, %s38_s23), 0 }
  0x1f   : > { %1878 = dma.vmem_to_smem (!%p2291_p7), %s328_s20, 16, %s2181_s26, [#allocation4]  }
  0x20   : > { %2615 = sst [smem:[#allocation11_spill]] %s2629_s23  ;;  %p104_p6 = scmp.ne.s32.totalorder %s2167_s11, %s2163_s10 }
  0x21   : > { %p105_p9 = scmp.eq.s32.totalorder %s2179_s14, 0  ;;  %s94_s27 = ssub.s32 %s2175_s13, %s2629_s23 }
  0x22   : > { %p1887_p10 = scmp.lt.s32.totalorder %s2179_s14, 2  ;;  %p95_p11 = scmp.eq.s32.totalorder %s94_s27, 0 }
  0x23   : > { %p106_p12 = por %p105_p9, %p104_p6  ;;  %s2310_s28 = sand.u32 1, %s2167_s11  }
  0x24   : > { %s1834_s29 = sshll.u32 %s2175_s13, 8  ;;  %s1733_s15 = sshll.u32 %s2310_s28, 4 }
  0x25   : > { %s2314_s30 = scalar_select %p95_p11, %s2167_s11, %s97_s24  }
  0x26   : > { %s2616_s2 = sld [smem:[#allocation12_spill]]  ;;  %s342_s22 = scalar_lea.vmem [#allocation2], %s1733_s15 }
  0x27   : > { %s350_s25 = sshll.u32 %s342_s22, 4  ;;  %p2322_p7 = pnand %p1887_p10, %p106_p12  ;;  %s2326_s25 = int_to_ptr.vmem [resolvable:$true] %s350_s25 }
  0x28   : > { %s339_s27 = scalar_lea.sflag [#allocation3], %s2310_s28 }
  0x29   : > { %p2063_p13 = pneg %p2322_p7 }
  0x2c   : > { %s2320_s20 = scalar_lea.hbm %s2616_s2, %s1834_s29  ;;  %s2066_s18 = scalar_lea.hbm %s2616_s2, 512 }
  0x2d   : > { %s2061_s8 = scalar_lea.hbm %s2320_s20, 256  ;;  %p2067_p3 = scmp.lt.u32.totalorder %s2320_s20, %s2616_s2 }
  0x2e   : > { %p2062_p8 = scmp.ne.s32.totalorder %s2320_s20, %s2061_s8  ;;  %p2068_p6 = scmp.lt.u32.totalorder %s2066_s18, %s2061_s8 }
  0x2f   : > { %p2070_p10 = scmp.lt.u32.totalorder %s2061_s8, %s2320_s20 }
  0x30   : > { %p2064_p0 = pnand %p2063_p13, %p2062_p8  ;;  %p2069_p9 = por %p2068_p6, %p2067_p3 }
  0x32   : > { %p2065_p2 = pneg %p2064_p0  ;;  %p2071_p11 = por %p2070_p10, %p2069_p9 }
  0x34   : > { %p2072_p12 = pnand %p2071_p11, %p2065_p2 }
  0x36   : > { %2075 = shalt.err (!%p2072_p12)
}
  0x37   : > { %s2076_s24 = scalar_lea.vmem %s2326_s25, 256  ;;  %s2182_s29 = smov [#allocation2]  }
  0x38   : > { %p2077_p8 = scmp.ne.s32.totalorder %s2326_s25, %s2076_s24  ;;  %s2081_s15 = sshll.u32 %s2182_s29, 4  ;;  %s2082_s15 = int_to_ptr.vmem [resolvable:$false] %s2081_s15 }
  0x39   : > { %s2083_s19 = scalar_lea.vmem %s2082_s15, 512  ;;  %p2084_p4 = scmp.lt.s32.totalorder %s2326_s25, %s2082_s15 }
  0x3a   : > { %p2079_p0 = pnand %p2077_p8, %p2063_p13  ;;  %p2085_p3 = scmp.lt.s32.totalorder %s2083_s19, %s2076_s24 }
  0x3c   : > { %p2080_p1 = pneg %p2079_p0  ;;  %p2086_p6 = por %p2085_p3, %p2084_p4 }
  0x3e   : > { %p2087_p9 = pnand %p2086_p6, %p2080_p1 }
  0x40   : > { %2090 = shalt.err (!%p2087_p9)
}
  0x41   : > { %1882 = dma.hbm_to_vmem [thread:$0]  (!%p2322_p7), %s2320_s20, 256, %s2326_s25, %s339_s27  }
  0x42   : > { %s1864_s8 = smul.u32 9600, %s2175_s13  ;;  %s372_s15 = scalar_lea.sflag [#allocation6], %s2310_s28 }
  0x43   : > { %s2618_s18 = smul.u32 600, %s2310_s28  ;;  %s2096_s27 = scalar_lea.hbm %s2599_s5, 19200 }
  0x44   : > { %s2361_s24 = scalar_lea.hbm %s2599_s5, %s1864_s8 }
  0x45   : > { %s375_s22 = scalar_lea.vmem [#allocation5], %s2618_s18  ;;  %s2091_s19 = scalar_lea.hbm %s2361_s24, 9600 }
  0x46   : > { %s382_s29 = sshll.u32 %s375_s22, 4  ;;  %p2092_p1 = scmp.ne.s32.totalorder %s2361_s24, %s2091_s19  ;;  %s2363_s29 = int_to_ptr.vmem [resolvable:$true] %s382_s29 }
  0x47   : > { %p2097_p10 = scmp.lt.u32.totalorder %s2361_s24, %s2599_s5  ;;  %p2098_p11 = scmp.lt.u32.totalorder %s2096_s27, %s2091_s19 }
  0x48   : > { %p2094_p4 = pnand %p2092_p1, %p2063_p13  ;;  %p2100_p8 = scmp.lt.u32.totalorder %s2091_s19, %s2361_s24 }
  0x49   : > { %p2099_p12 = por %p2098_p11, %p2097_p10 }
  0x4a   : > { %p2095_p2 = pneg %p2094_p4 }
  0x4b   : > { %p2101_p0 = por %p2100_p8, %p2099_p12 }
  0x4d   : > { %p2102_p3 = pnand %p2101_p0, %p2095_p2 }
  0x4f   : > { %2105 = shalt.err (!%p2102_p3)
}
  0x50   : > { %s2106_s8 = scalar_lea.vmem %s2363_s29, 9600  ;;  %s2183_s18 = smov [#allocation5]  }
  0x51   : > { %p2107_p6 = scmp.ne.s32.totalorder %s2363_s29, %s2106_s8  ;;  %s2111_s22 = sshll.u32 %s2183_s18, 4  ;;  %s2112_s22 = int_to_ptr.vmem [resolvable:$false] %s2111_s22 }
  0x52   : > { %s2113_s20 = scalar_lea.vmem %s2112_s22, 19200  ;;  %p2114_p4 = scmp.lt.s32.totalorder %s2363_s29, %s2112_s22 }
  0x53   : > { %p2109_p9 = pnand %p2107_p6, %p2063_p13  ;;  %p2115_p10 = scmp.lt.s32.totalorder %s2113_s20, %s2106_s8 }
  0x55   : > { %p2110_p1 = pneg %p2109_p9  ;;  %p2116_p11 = por %p2115_p10, %p2114_p4 }
  0x57   : > { %p2117_p12 = pnand %p2116_p11, %p2110_p1 }
  0x59   : > { %2120 = shalt.err (!%p2117_p12)
}
  0x5a   : > { %s2184_s19 = smov 192   ;;  %s2185_s25 = smov 12  }
  0x5b   : > { %1885 = dma.hbm_to_vmem [thread:$0]  (!%p2322_p7), %s2361_s24, 9600, %s2363_s29, %s372_s15, %s2184_s19, %s2184_s19, %s2185_s25  }
  0x5c   : > { %408 = sbr.rel (%p2283_p5) target bundleno = 768 (0x300), region = 56  ;;  %s410_s27 = sand.u32 (!%p2283_p5), 1, %s2163_s10  }
  0x5d   : > { %s1738_s2 = sshll.u32 (!%p2283_p5), %s410_s27, 4  ;;  %s411_s23 = scalar_lea.sflag (!%p2283_p5), [#allocation3], %s410_s27 }
  0x5e   : > { %s2394_s8 = scalar_lea.vmem (!%p2283_p5), [#allocation2], %s1738_s2  ;;  %p2619_p13 = scmp.ne.s32.totalorder (!%p2283_p5), %s2611_s17, 0 }
  0x63   : > { %2146 = dma.done.wait (%p2619_p13), %s411_s23, 256  }
  0x64   : > { %2148 = vsyncadd (%p2619_p13), %s411_s23, 4294967040  ;;  %s1865_s18 = smul.u32 600, %s410_s27  ;;  %s420_s26 = scalar_lea.sflag [#allocation6], %s410_s27 }
  0x66   : > { %s2400_s28 = scalar_lea.vmem [#allocation5], %s1865_s18 }
  0x67   : > { %2150 = dma.done.wait (%p2619_p13), %s420_s26, 9600  }
  0x68   : > { %2152 = vsyncadd (%p2619_p13), %s420_s26, 4294957696  ;;  %p2620_p5 = scmp.ne.s32.totalorder %s2610_s16, 0 }
  0x6a   : > { %2154 = dma.done.wait (%p2620_p5), [#allocation4], 16  }
  0x6b   : > { %2156 = vsyncadd (%p2620_p5), [#allocation4], 4294967280 }
  0x6c   : > { %432 = sfence }
  0x6d   : > { %p501_p7 = scmp.lt.s32.totalorder %s2171_s12, 1  ;;  %v543_v0 = vlaneseq  ;;  %v2186_v1 = vmov 1966171168   ;;  %v2187_v3 = vmov 0   ;;  %v1946_v5 = vld [vmem:[%s2400_s28 + $0x4] ss:$12 sps:$4 sm:$0xff]  }
  0x6e   : > { %v541_v2 = vunpack.c.l.s4 %v2186_v1  ;;  %605 = vmatprep.mubr.bf16.mxu1 %v2187_v3  ;;  %v1948_v7 = vld [vmem:[%s2400_s28] ss:$12 sps:$4 sm:$0xff]   ;;  %1319 = vmatprep.subr.bf16.mxu0 %v1946_v5  ;;  %v1949_v8 = vld [vmem:[%s2400_s28 + $0x1c] ss:$12 sps:$4 sm:$0xff]   ;;  %vm560_vm0 = vcmask 1040384   ;;  %vm556_vm1 = vcmask 15360  }
  0x6f   : > { %s2413_s17 = scalar_select %p501_p7, %s2171_s12, 1  ;;  %v2416_v4 = vshrl.u32 %v543_v0, 7  ;;  %1320 = vmatpush1.bf16.msra.mxu0 %v1948_v7  ;;  %v1951_v10 = vld [vmem:[%s2400_s28 + $0x18] ss:$12 sps:$4 sm:$0xff]   ;;  %v1952_v12 = vld [vmem:[%s2400_s28 + $0x34] ss:$12 sps:$4 sm:$0xff]  }
  0x70   : > { %v542_v6 = vunpack.c.0.s8 %v541_v2  ;;  %1321 = vmatprep.subr.bf16.mxu0 %v1949_v8  ;;  %v526_v15 = vld [vmem:[%s2595_s1] sm:$0xff]  ;;  %v1954_v20 = vld [vmem:[%s2400_s28 + $0x30] ss:$12 sps:$4 sm:$0xff]   ;;  %vm669_vm2 = vcmask 1043456   ;;  %v529_v28 = vld [vmem:[%s2394_s8 + $0x8] sm:$0xff]  ;;  %vm665_vm3 = vcmask 64512  }
  0x71   : > { %s1740_s16 = sshll.u32 %s2413_s17, 2  ;;  %v528_v19 = vld [vmem:[%s2394_s8] sm:$0xff]  ;;  %v527_v23 = vpack.c.bf16 %v526_v15, %v526_v15  ;;  %v1957_v26 = vld [vmem:[%s2400_s28 + $0x48] ss:$12 sps:$4 sm:$0xff]   ;;  %v1750_v35 = vcombine.high %v529_v28, %v529_v28  ;;  %v1749_v39 = vcombine.low %v529_v28, %v529_v28  ;;  %vm1315_vm4 = vcmask 130048   ;;  %s1866_s23 = smul.u32 3, %s2413_s17 }
  0x72   : > { %s504_s24 = scalar_lea.vmem %s2597_s3, %s1740_s16  ;;  %v545_v9 = vsub.s32 %v542_v6, %v2416_v4  ;;  %v1955_v21 = vld [vmem:[%s2400_s28 + $0x4c] ss:$12 sps:$4 sm:$0xff]   ;;  %v1748_v25 = vcombine.high %v528_v19, %v528_v19  ;;  %v1958_v27 = vld [vmem:[%s2400_s28 + $0x64] ss:$12 sps:$4 sm:$0xff]   ;;  %v1747_v29 = vcombine.low %v528_v19, %v528_v19  ;;  %v1961_v31 = vld [vmem:[%s2400_s28 + $0x7c] ss:$12 sps:$4 sm:$0xff]   ;;  %s508_s2 = scalar_lea.vmem %s2598_s4, %s1740_s16 }
  0x73   : > { %v1742_v11 = vld.sshfl [vmem:[%s504_s24] sm:$0x33 pattern:$0x75316420]  ;;  %1322 = vmatpush1.bf16.msra.mxu0 %v1951_v10  ;;  %v1963_v32 = vld [vmem:[%s2400_s28 + $0x78] ss:$12 sps:$4 sm:$0xff]   ;;  %s516_s26 = scalar_lea.vmem %s2601_s7, %s1866_s23  ;;  %s512_s21 = scalar_lea.vmem %s2600_s6, %s1866_s23 }
  0x74   : > { %v539_v13 = vcombine.high %v1742_v11, %v1742_v11  ;;  %v546_v14 = vrot.slane %v1742_v11, %v545_v9  ;;  %1323 = vmatprep.subr.bf16.mxu0 %v1952_v12  ;;  %v1960_v30 = vld [vmem:[%s2400_s28 + $0x60] ss:$12 sps:$4 sm:$0xff]   ;;  %v671_v34 = vsel %vm669_vm2, %v1747_v29, 0  ;;  %v1966_v37 = vld [vmem:[%s2400_s28 + $0x90] ss:$12 sps:$4 sm:$0xff]   ;;  %v677_v44 = vsel %vm669_vm2, %v1749_v39, 0  ;;  %s522_s22 = scalar_lea.vmem %s2603_s9, %s2413_s17 }
  0x75   : > { %v1964_v33 = vld [vmem:[%s2400_s28 + $0x94] ss:$12 sps:$4 sm:$0xff]   ;;  %v1967_v38 = vld [vmem:[%s2400_s28 + $0xac] ss:$12 sps:$4 sm:$0xff]   ;;  %v1970_v43 = vld [vmem:[%s2400_s28 + $0xc4] ss:$12 sps:$4 sm:$0xff]  }
  0x76   : > { %v553_v16 = vrot.slane %v539_v13, %v545_v9  ;;  %v554_v17 = vcombine.high %v546_v14, %v546_v14  ;;  %v562_v18 = vsel %vm560_vm0, %v546_v14, 0  ;;  %v524_v36 = vld [vmem:[%s2594_s0] sm:$0xff]  ;;  %v1983_v53 = vld [vmem:[%s2400_s28 + $0xf0] ss:$12 sps:$4 sm:$0xff]   ;;  %vm1518_vm5 = vcmask 359424   ;;  %s1523_s29 = sld [smem:[#allocation7 + %s2171_s12]] }
  0x77   : > { %1324 = vmatpush1.bf16.msra.mxu0 %v1954_v20  ;;  %v525_v40 = vpack.c.bf16 %v524_v36, %v524_v36  ;;  %v1969_v41 = vld [vmem:[%s2400_s28 + $0xa8] ss:$12 sps:$4 sm:$0xff]   ;;  %v1973_v45 = vld [vmem:[%s2400_s28 + $0xc0] ss:$12 sps:$4 sm:$0xff]   ;;  %v1978_v49 = vld [vmem:[%s2400_s28 + $0xd8] ss:$12 sps:$4 sm:$0xff]  }
  0x78   : > { %v555_v22 = vcombine.high %v553_v16, %v553_v16  ;;  %1743 = vmatprep.subr.msk.bf16.mxu1 %vm560_vm0, %v553_v16  ;;  %v568_v24 = vsel %vm560_vm0, %v554_v17, 0  ;;  %1325 = vmatprep.subr.bf16.mxu0 %v1955_v21  ;;  %v1972_v42 = vld [vmem:[%s2400_s28 + $0xc8] ss:$12 sps:$4 sm:$0xff]   ;;  %v1977_v48 = vld [vmem:[%s2400_s28 + $0xe0] ss:$12 sps:$4 sm:$0xff]   ;;  %v780_v36 = vsub.s32 3, %v2416_v4 }
  0x79   : > { %574 = vmatpush1.bf16.msra.mxu1 %v562_v18  ;;  %v1975_v46 = vld [vmem:[%s2400_s28 + $0xdc] ss:$12 sps:$4 sm:$0xff]   ;;  %v1979_v50 = vld [vmem:[%s2400_s28 + $0x20] ss:$12 sps:$4 sm:$0xff]   ;;  %v1982_v52 = vld [vmem:[%s2400_s28 + $0xf8] ss:$12 sps:$4 sm:$0xff]  }
  0x7a   : > { %1745 = vmatprep.subr.msk.bf16.mxu1 %vm560_vm0, %v555_v22  ;;  %v1974_v47 = vld [vmem:[%s2400_s28 + $0x8] ss:$12 sps:$4 sm:$0xff]   ;;  %v1984_v54 = vld [vmem:[%s2400_s28 + $0x38] ss:$12 sps:$4 sm:$0xff]   ;;  %v1987_v56 = vld [vmem:[%s2400_s28 + $0x110] ss:$12 sps:$4 sm:$0xff]  }
  0x7b   : > { %1326 = vmatpush1.bf16.msra.mxu0 %v1957_v26  ;;  %v1980_v51 = vld [vmem:[%s2400_s28 + $0xf4] ss:$12 sps:$4 sm:$0xff]   ;;  %v1985_v55 = vld [vmem:[%s2400_s28 + $0x10c] ss:$12 sps:$4 sm:$0xff]   ;;  %v1989_v58 = vld [vmem:[%s2400_s28 + $0x50] ss:$12 sps:$4 sm:$0xff]  }
  0x7c   : > { %1744 = vmatmul.mubr.msk.bf16.vlgmr.msra.gmra.mrb[0].mxu1 %vm556_vm1, %v527_v23  ;;  %1327 = vmatprep.subr.bf16.mxu0 %v1958_v27  ;;  %v1988_v57 = vld [vmem:[%s2400_s28 + $0x108] ss:$12 sps:$4 sm:$0xff]   ;;  %v1990_v59 = vld [vmem:[%s2400_s28 + $0x124] ss:$12 sps:$4 sm:$0xff]   ;;  %v1993_v61 = vld [vmem:[%s2400_s28 + $0x120] ss:$12 sps:$4 sm:$0xff]  }
  0x7d   : > { %615 = vmatpush1.bf16.msra.mxu1 %v568_v24  ;;  %646 = vmatprep.mubr.bf16.mxu1 %v2187_v3  ;;  %v1992_v60 = vld [vmem:[%s2400_s28 + $0x128] ss:$12 sps:$4 sm:$0xff]   ;;  %v1997_v1 = vld [vmem:[%s2400_s28 + $0x140] ss:$12 sps:$4 sm:$0xff]   ;;  %v1998_v2 = vld [vmem:[%s2400_s28 + $0x138] ss:$12 sps:$4 sm:$0xff]  }
  0x7e   : > { %1751 = vmatprep.subr.msk.bf16.mxu1 %vm669_vm2, %v1748_v25  ;;  %v1994_v62 = vld [vmem:[%s2400_s28 + $0x68] ss:$12 sps:$4 sm:$0xff]   ;;  %v1999_v5 = vld [vmem:[%s2400_s28 + $0x80] ss:$12 sps:$4 sm:$0xff]   ;;  %v2002_v7 = vld [vmem:[%s2400_s28 + $0x158] ss:$12 sps:$4 sm:$0xff]  }
  0x7f   : > { %1328 = vmatpush1.bf16.msra.mxu0 %v1960_v30  ;;  %v1995_v63 = vld [vmem:[%s2400_s28 + $0x13c] ss:$12 sps:$4 sm:$0xff]   ;;  %v2000_v6 = vld [vmem:[%s2400_s28 + $0x154] ss:$12 sps:$4 sm:$0xff]   ;;  %v2004_v9 = vld [vmem:[%s2400_s28 + $0x98] ss:$12 sps:$4 sm:$0xff]  }
  0x80   : > { %1329 = vmatprep.subr.bf16.mxu0 %v1961_v31  ;;  %v2003_v8 = vld [vmem:[%s2400_s28 + $0x150] ss:$12 sps:$4 sm:$0xff]   ;;  %v2005_v10 = vld [vmem:[%s2400_s28 + $0x16c] ss:$12 sps:$4 sm:$0xff]   ;;  %v2008_v12 = vld [vmem:[%s2400_s28 + $0x168] ss:$12 sps:$4 sm:$0xff]  }
  0x81   : > { %v2007_v11 = vld [vmem:[%s2400_s28 + $0x170] ss:$12 sps:$4 sm:$0xff]   ;;  %v764_v24 = vld [vmem:[%s508_s2] sm:$0xf]  ;;  %v772_v25 = vsub.s32 1, %v2416_v4  ;;  %vm1534_vm6 = vcmask 57344  }
  0x82   : > { %v2009_v13 = vld [vmem:[%s2400_s28 + $0xb0] ss:$12 sps:$4 sm:$0xff]  }
  0x83   : > { %1330 = vmatpush1.bf16.msra.mxu0 %v1963_v32  ;;  %v2012_v14 = vld [vmem:[%s2400_s28 + $0x184] ss:$12 sps:$4 sm:$0xff]   ;;  %v773_v28 = vrot.slane %v764_v24, %v772_v25 }
  0x84   : > { %1746 = vmatmul.mubr.msk.bf16.vlgmr.msra.gmra.mrb[4].mxu1 %vm556_vm1, %v527_v23  ;;  %1331 = vmatprep.subr.bf16.mxu0 %v1964_v33  ;;  %v2504_v23 = vsub.s32 0, %v2416_v4 }
  0x85   : > { %683 = vmatpush1.bf16.msra.mxu1 %v671_v34  ;;  %714 = vmatprep.mubr.bf16.mxu1 %v2187_v3 }
  0x86   : > { %1753 = vmatprep.subr.msk.bf16.mxu1 %vm669_vm2, %v1750_v35  ;;  %v769_v26 = vrot.slane %v764_v24, %v2504_v23  ;;  %v2511_v35 = vsub.s32 2, %v2416_v4 }
  0x87   : > { %1332 = vmatpush1.bf16.msra.mxu0 %v1966_v37 }
  0x88   : > { %1333 = vmatprep.subr.bf16.mxu0 %v1967_v38 }
  0x8b   : > { %1334 = vmatpush1.bf16.msra.mxu0 %v1969_v41 }
  0x8c   : > { %1752 = vmatmul.mubr.msk.bf16.vlgmr.msra.gmra.mrb[8].mxu1 %vm665_vm3, %v525_v40  ;;  %1335 = vmatprep.subr.bf16.mxu0 %v1970_v43 }
  0x8d   : > { %724 = vmatpush1.bf16.msra.mxu1 %v677_v44  ;;  %755 = vmatprep.mubr.bf16.mxu1 %v2187_v3  ;;  %v2010_v44 = vld [vmem:[%s2400_s28 + $0x180] ss:$12 sps:$4 sm:$0xff]  }
  0x8e   : > { %1835 = vmatprep.subr.bf16.mxu1 %v1972_v42  ;;  %v781_v42 = vrot.slane %v764_v24, %v780_v36 }
  0x8f   : > { %1336 = vmatpush1.bf16.msra.mxu0 %v1973_v45  ;;  %v2013_v45 = vld [vmem:[%s2400_s28 + $0x188] ss:$12 sps:$4 sm:$0xff]  }
  0x90   : > { %1337 = vmatprep.subr.bf16.mxu0 %v1975_v46 }
  0x93   : > { %1338 = vmatpush1.bf16.msra.mxu0 %v1978_v49  ;;  %v2016_v49 = vld [vmem:[%s2400_s28 + $0x19c] ss:$12 sps:$4 sm:$0xff]  }
  0x94   : > { %1754 = vmatmul.mubr.msk.bf16.vlgmr.msra.gmra.mrb[12].mxu1 %vm665_vm3, %v525_v40  ;;  %1339 = vmatprep.subr.bf16.mxu0 %v1980_v51  ;;  %v777_v40 = vrot.slane %v764_v24, %v2511_v35 }
  0x95   : > { %1836 = vmatpush3.bf16.msra.mxu1 %v1974_v47 }
  0x96   : > { %1837 = vmatprep.subr.bf16.mxu1 %v1977_v48 }
  0x97   : > { %1340 = vmatpush1.bf16.msra.mxu0 %v1983_v53 }
  0x98   : > { %1341 = vmatprep.subr.bf16.mxu0 %v1985_v55  ;;  %v2014_v55 = vld [vmem:[%s2400_s28 + $0x198] ss:$12 sps:$4 sm:$0xff]  }
  0x99   : > { %1838 = vmatpush3.bf16.msra.mxu1 %v1979_v50 }
  0x9a   : > { %1839 = vmatprep.subr.bf16.mxu1 %v1982_v52 }
  0x9b   : > { %1342 = vmatpush1.bf16.msra.mxu0 %v1988_v57  ;;  %v2020_v57 = vld [vmem:[%s2400_s28 + $0x1b4] ss:$12 sps:$4 sm:$0xff]  }
  0x9c   : > { %1343 = vmatprep.subr.bf16.mxu0 %v1990_v59 }
  0x9d   : > { %1840 = vmatpush3.bf16.msra.mxu1 %v1984_v54 }
  0x9e   : > { %1841 = vmatprep.subr.bf16.mxu1 %v1987_v56  ;;  %v2017_v56 = vld [vmem:[%s2400_s28 + $0x1a0] ss:$12 sps:$4 sm:$0xff]  }
  0x9f   : > { %1344 = vmatpush1.bf16.msra.mxu0 %v1993_v61  ;;  %v2021_v61 = vld [vmem:[%s2400_s28 + $0x1b8] ss:$12 sps:$4 sm:$0xff]  }
  0xa0   : > { %1345 = vmatprep.subr.bf16.mxu0 %v1995_v63  ;;  %v2022_v63 = vld [vmem:[%s2400_s28 + $0x1c8] ss:$12 sps:$4 sm:$0xff]  }
  0xa1   : > { %1842 = vmatpush3.bf16.msra.mxu1 %v1989_v58 }
  0xa2   : > { %1843 = vmatprep.subr.bf16.mxu1 %v1992_v60  ;;  %v2018_v60 = vld [vmem:[%s2400_s28 + $0x1b0] ss:$12 sps:$4 sm:$0xff]  }
  0xa3   : > { %1346 = vmatpush1.bf16.msra.mxu0 %v1998_v2  ;;  %v2028_v2 = vld [vmem:[%s2400_s28 + $0x1e4] ss:$12 sps:$4 sm:$0xff]  }
  0xa4   : > { %1347 = vmatprep.subr.bf16.mxu0 %v2000_v6  ;;  %v2029_v6 = vld [vmem:[%s2400_s28 + $0x1e8] ss:$12 sps:$4 sm:$0xff]  }
  0xa5   : > { %1844 = vmatpush3.bf16.msra.mxu1 %v1994_v62  ;;  %v2024_v62 = vld [vmem:[%s2400_s28 + $0x1cc] ss:$12 sps:$4 sm:$0xff]  }
  0xa6   : > { %1845 = vmatprep.subr.bf16.mxu1 %v1997_v1  ;;  %v2025_v1 = vld [vmem:[%s2400_s28 + $0x1d0] ss:$12 sps:$4 sm:$0xff]  }
  0xa7   : > { %1348 = vmatpush1.bf16.msra.mxu0 %v2003_v8  ;;  %v2030_v8 = vld [vmem:[%s2400_s28 + $0x1f8] ss:$12 sps:$4 sm:$0xff]  }
  0xa8   : > { %1349 = vmatprep.subr.bf16.mxu0 %v2005_v10  ;;  %v2036_v10 = vld [vmem:[%s2400_s28 + $0x214] ss:$12 sps:$4 sm:$0xff]  }
  0xa9   : > { %1846 = vmatpush3.bf16.msra.mxu1 %v1999_v5  ;;  %v2026_v5 = vld [vmem:[%s2400_s28 + $0x1e0] ss:$12 sps:$4 sm:$0xff]  }
  0xaa   : > { %1847 = vmatprep.subr.bf16.mxu1 %v2002_v7  ;;  %v2032_v7 = vld [vmem:[%s2400_s28 + $0x1fc] ss:$12 sps:$4 sm:$0xff]  }
  0xab   : > { %1350 = vmatpush1.bf16.msra.mxu0 %v2008_v12  ;;  %v2037_v12 = vld [vmem:[%s2400_s28 + $0x218] ss:$12 sps:$4 sm:$0xff]  }
  0xac   : > { %1360 = vmatprep.subr.bf16.mxu0 %v2012_v14  ;;  %v2038_v14 = vld [vmem:[%s2400_s28 + $0x228] ss:$12 sps:$4 sm:$0xff]  }
  0xad   : > { %1848 = vmatpush3.bf16.msra.mxu1 %v2004_v9  ;;  %v2033_v9 = vld [vmem:[%s2400_s28 + $0x200] ss:$12 sps:$4 sm:$0xff]  }
  0xae   : > { %1849 = vmatprep.subr.bf16.mxu1 %v2007_v11  ;;  %v2034_v11 = vld [vmem:[%s2400_s28 + $0x210] ss:$12 sps:$4 sm:$0xff]  }
  0xb1   : > { %1850 = vmatpush3.bf16.msra.mxu1 %v2009_v13  ;;  %v2040_v13 = vld [vmem:[%s2400_s28 + $0x22c] ss:$12 sps:$4 sm:$0xff]  }
  0xb2   : > { %1441 = vmatprep.subr.bf16.mxu1 %v2187_v3 }
 0x14f   : > { %v607_v15 = vpop.f32.mrb[0].mxu1 }
 0x150   : > { %v609_v16 = vpop.f32.mrb[1].mxu1 }
 0x151   : > { %v611_v17 = vpop.f32.mrb[2].mxu1 }
 0x152   : > { %v612_v18 = vpop.f32.mrb[3].mxu1  ;;  %v2042_v17 = vld [vmem:[%s2400_s28 + $0x240] ss:$12 sps:$4 sm:$0xff]  }
 0x153   : > { %v2045_v18 = vld [vmem:[%s2400_s28 + $0x248] ss:$12 sps:$4 sm:$0xff]  }
 0x157   : > { %v648_v19 = vpop.f32.mrb[4].mxu1 }
 0x158   : > { %v650_v20 = vpop.f32.mrb[5].mxu1 }
 0x159   : > { %v652_v21 = vpop.f32.mrb[6].mxu1 }
 0x15a   : > { %v653_v22 = vpop.f32.mrb[7].mxu1 }
 0x15f   : > { %v716_v27 = vpop.f32.mrb[8].mxu1 }
 0x160   : > { %v717_v29 = vadd.f32 %v716_v27, %v607_v15  ;;  %v718_v30 = vpop.f32.mrb[9].mxu1  ;;  %v2041_v15 = vld [vmem:[%s2400_s28 + $0x230] ss:$12 sps:$4 sm:$0xff]  }
 0x161   : > { %v719_v31 = vadd.f32 %v718_v30, %v609_v16  ;;  %v720_v32 = vpop.f32.mrb[10].mxu1  ;;  %v2044_v16 = vld [vmem:[%s2400_s28 + $0x244] ss:$12 sps:$4 sm:$0xff]   ;;  %v1497_v30 = vsub.s32 4, %v2416_v4 }
 0x162   : > { %v786_v33 = vadd.f32 %v769_v26, %v717_v29  ;;  %v721_v34 = vpop.f32.mrb[11].mxu1 }
 0x163   : > { %v787_v37 = vadd.f32 %v773_v28, %v719_v31  ;;  %v898_v28 = vld [vmem:[%s512_s21] sm:$0x7] }
 0x164   : > { %v790_v38 = vmax.f32 %v786_v33, 0.0  ;;  %v911_v31 = vrot.slane %v898_v28, %v2511_v35  ;;  %v903_v32 = vrot.slane %v898_v28, %v2504_v23  ;;  %v907_v36 = vrot.slane %v898_v28, %v772_v25 }
 0x165   : > { %v791_v39 = vmax.f32 %v787_v37, 0.0 }
 0x166   : > { %v794_v46 = vpack.c.bf16 %v790_v38, %v790_v38 }
 0x167   : > { %v757_v41 = vpop.f32.mrb[12].mxu1  ;;  %v795_v43 = vpack.c.bf16 %v791_v39, %v791_v39 }
 0x168   : > { %v758_v47 = vadd.f32 %v757_v41, %v648_v19  ;;  %v759_v48 = vpop.f32.mrb[13].mxu1 }
 0x169   : > { %v760_v50 = vadd.f32 %v759_v48, %v650_v20  ;;  %1351 = vmatprep.mubr.bf16.mxu0 %v795_v43  ;;  %1433 = vmatprep.mubr.bf16.mxu1 %v795_v43  ;;  %v761_v51 = vpop.f32.mrb[14].mxu1 }
 0x16a   : > { %v2518_v52 = vadd.f32 %v777_v40, %v758_v47  ;;  %1352 = vmatmul.mubr.bf16.vlgmr.msra.gmra.mrb[0].mxu0 %v794_v46  ;;  %1434 = vmatmul.mubr.bf16.vlgmr.msra.gmra.mrb[16].mxu1 %v794_v46  ;;  %v762_v53 = vpop.f32.mrb[15].mxu1 }
 0x16b   : > { %v789_v54 = vadd.f32 %v781_v42, %v760_v50  ;;  %1361 = vmatpush1.bf16.msra.mxu0 %v2010_v44  ;;  %1442 = vmatpush1.bf16.msra.mxu1 %v2013_v45 }
 0x16c   : > { %1362 = vmatprep.subr.bf16.mxu0 %v2016_v49  ;;  %1443 = vmatprep.subr.bf16.mxu1 %v2187_v3  ;;  %v792_v19 = vmax.f32 %v2518_v52, 0.0 }
 0x16d   : > { %v793_v58 = vmax.f32 %v789_v54, 0.0 }
 0x16e   : > { %v796_v20 = vpack.c.bf16 %v792_v19, %v792_v19 }
 0x16f   : > { %v797_v59 = vpack.c.bf16 %v793_v58, %v793_v58  ;;  %1363 = vmatpush1.bf16.msra.mxu0 %v2014_v55  ;;  %1444 = vmatpush1.bf16.msra.mxu1 %v2017_v56 }
 0x170   : > { %1364 = vmatprep.subr.bf16.mxu0 %v2020_v57  ;;  %1445 = vmatprep.subr.bf16.mxu1 %v2187_v3 }
 0x171   : > { %1830 = vmatprep.mubr.msk.bf16.mxu0 %vm1315_vm4, %v797_v59  ;;  %1831 = vmatprep.mubr.msk.bf16.mxu1 %vm1315_vm4, %v797_v59 }
 0x173   : > { %1365 = vmatpush1.bf16.msra.mxu0 %v2018_v60  ;;  %1446 = vmatpush1.bf16.msra.mxu1 %v2021_v61  ;;  %v1524_v60 = vstv %s1523_s29 }
 0x174   : > { %1366 = vmatprep.subr.bf16.mxu0 %v2024_v62  ;;  %1447 = vmatprep.subr.bf16.mxu1 %v2187_v3 }
 0x177   : > { %1367 = vmatpush1.bf16.msra.mxu0 %v2022_v63  ;;  %1448 = vmatpush1.bf16.msra.mxu1 %v2025_v1 }
 0x178   : > { %1368 = vmatprep.subr.bf16.mxu0 %v2028_v2  ;;  %1449 = vmatprep.subr.bf16.mxu1 %v2187_v3 }
 0x17b   : > { %1369 = vmatpush1.bf16.msra.mxu0 %v2026_v5  ;;  %1450 = vmatpush1.bf16.msra.mxu1 %v2029_v6 }
 0x17c   : > { %1370 = vmatprep.subr.bf16.mxu0 %v2032_v7  ;;  %1451 = vmatprep.subr.bf16.mxu1 %v2187_v3 }
 0x17f   : > { %1371 = vmatpush1.bf16.msra.mxu0 %v2030_v8  ;;  %1452 = vmatpush1.bf16.msra.mxu1 %v2033_v9 }
 0x180   : > { %1372 = vmatprep.subr.bf16.mxu0 %v2036_v10  ;;  %1453 = vmatprep.subr.bf16.mxu1 %v2187_v3 }
 0x183   : > { %1373 = vmatpush1.bf16.msra.mxu0 %v2034_v11  ;;  %1454 = vmatpush1.bf16.msra.mxu1 %v2037_v12 }
 0x184   : > { %1374 = vmatprep.subr.bf16.mxu0 %v2040_v13  ;;  %1455 = vmatprep.subr.bf16.mxu1 %v2187_v3 }
 0x187   : > { %1375 = vmatpush1.bf16.msra.mxu0 %v2038_v14  ;;  %1456 = vmatpush1.bf16.msra.mxu1 %v2041_v15 }
 0x188   : > { %1376 = vmatprep.subr.bf16.mxu0 %v2044_v16  ;;  %1457 = vmatprep.subr.bf16.mxu1 %v2187_v3  ;;  %v1484_v3 = vld [vmem:[%s516_s26] sm:$0x7] }
 0x189   : > { %v1485_v29 = vunpack.c.l.bf16 %v1484_v3 }
 0x18b   : > { %1377 = vmatpush1.bf16.msra.mxu0 %v2042_v17  ;;  %1458 = vmatpush1.bf16.msra.mxu1 %v2045_v18  ;;  %v1490_v33 = vrot.slane %v1485_v29, %v2504_v23  ;;  %v1498_v34 = vrot.slane %v1485_v29, %v1497_v30  ;;  %v1494_v37 = vrot.slane %v1485_v29, %v2511_v35 }
 0x18d   : > { %v1505_v42 = vrot.slane %v1490_v33, %v2504_v23  ;;  %v1513_v46 = vrot.slane %v1498_v34, %v2504_v23  ;;  %v1509_v48 = vrot.slane %v1494_v37, %v2504_v23  ;;  %v1528_v23 = vand.u32 127, %v543_v0 }
 0x18e   : > { %1393 = vmatmul.mubr.bf16.vlgmr.msra.gmra.mrb[0].mxu0 %v796_v20  ;;  %1474 = vmatmul.mubr.bf16.vlgmr.msra.gmra.mrb[20].mxu1 %v796_v20 }
 0x18f   : > { %v1531_v61 = vsub.s32 %v1528_v23, %v2416_v4 }
 0x23d   : > { %v1851_v21 = vpop.f32.mrb[16].mxu1 }
 0x23e   : > { %v1852_v22 = vpop.f32.mrb[17].mxu1 }
 0x23f   : > { %v1853_v24 = vadd.f32 %v1852_v22, %v1851_v21  ;;  %v1854_v26 = vpop.f32.mrb[18].mxu1 }
 0x240   : > { %v1855_v27 = vpop.f32.mrb[19].mxu1 }
 0x241   : > { %v1436_v38 = vadd.f32 %v1853_v24, %v911_v31 }
 0x261   : > { %v1394_v39 = vpop.f32.mrb[0].mxu0  ;;  %v1475_v40 = vpop.f32.mrb[20].mxu1 }
 0x262   : > { %v1857_v41 = vadd.f32 %v1394_v39, %v903_v32  ;;  %v1476_v43 = vadd.f32 %v1475_v40, %v1436_v38  ;;  %v1396_v44 = vpop.f32.mrb[1].mxu0  ;;  %v1477_v45 = vpop.f32.mrb[21].mxu1 }
 0x263   : > { %v1858_v47 = vadd.f32 %v1396_v44, %v907_v36  ;;  %v1398_v49 = vpop.f32.mrb[2].mxu0  ;;  %v1478_v50 = vpop.f32.mrb[22].mxu1 }
 0x264   : > { %v1481_v25 = vmax.f32 %v1857_v41, 0.0  ;;  %v1483_v51 = vmax.f32 %v1476_v43, 0.0  ;;  %v1399_v35 = vpop.f32.mrb[3].mxu0  ;;  %v1479_v52 = vpop.f32.mrb[23].mxu1 }
 0x265   : > { %v1482_v53 = vmax.f32 %v1858_v47, 0.0 }
 0x266   : > { %v1514_v54 = vmul.f32 %v1505_v42, %v1481_v25  ;;  %v1516_v55 = vmul.f32 %v1513_v46, %v1483_v51 }
 0x267   : > { %v1515_v56 = vmul.f32 %v1509_v48, %v1482_v53 }
 0x268   : > { %v1519_v58 = vsel %vm1518_vm5, %v1516_v55, 0.0 }
 0x269   : > { %v1517_v57 = vadd.f32 %v1515_v56, %v1514_v54 }
 0x26b   : > { %v1520_v59 = vadd.f32 %v1519_v58, %v1517_v57 }
 0x26d   : > { %1521 = vadd.xlane.f32.xlu0 %v1520_v59 }
 0x2fa   : > { %v1522_v62 = vpop.xlane.xlu0 %1521 }
 0x2fb   : > { %v1525_v63 = vadd.f32 %v1524_v60, %v1522_v62 }
 0x2fd   : > { %v1532_v1 = vrot.slane %v1525_v63, %v1531_v61 }
 0x2ff   : > { %1535 = vst.msk [vmem:[%s522_s22] sm:$0x1] %vm1534_vm6, %v1532_v1 }
 0x300 PF: > { %s26_s14 = sadd.s32 1, %s2179_s14   ;;  %s2621_s12 = smov %s2314_s30 }
 0x301   : > { %p23_p2 = scmp.ge.s32.totalorder %s26_s14, 4   ;;  %s2622_s20 = sld [smem:[#allocation11_spill]] }
 0x302   : > { %s2623_s30 = smov %s2163_s10  ;;  %s2624_s10 = smov %s2167_s11 }
 0x303   : > { %s2625_s11 = smov %s2621_s12  ;;  %s2626_s12 = smov %s2175_s13 }
 0x304   :  { %25 = sbr.rel (!%p23_p2) target bundleno = 10 (0xa), region = 132 }
 0x307   : > { %s2627_s13 = smov %s2622_s20 }
 0x30b   :  { %1559 = vsyncpa [#allocation3], 1 }
 0x30c   :  { %1561 = vsyncpa [#allocation3 + $0x1], 1 }
 0x30d   :  { %1562 = vsyncpa [#allocation6], 1 }
 0x30e   :  { %1564 = vsyncpa [#allocation6 + $0x1], 1 }
 0x30f   :  { %1565 = vsyncpa [#allocation4], 1 }
 0x310   :  { %1567 = vsyncpa [#allocation4 + $0x1], 1 }

</bundles_post_ra>
